<compile_context>
chip_gen: v7x
topology: tpu7x:2x2x1
jax: 0.10.0
libtpu: 0.0.40
codegen_flags: <defaults>
</compile_context>

<pallas_src>
import functools

import jax
import jax.numpy as jnp
from jax import lax
from jax.experimental import pallas as pl
from jax.experimental.pallas import tpu as pltpu

_LANE_WIDTHS = (4096, 2048, 1024, 512, 256, 128)
_TARGET_BLOCK_BYTES = 2 << 20   # ~2 MiB per input array per block (per buffer)
_NUM_CORES = 2                  # outer 'parallel' split for v7x megacore


def _smooth_l1_elem(pred, gt, beta):
    diff = pred - gt
    abs_diff = jnp.abs(diff)
    if beta == 0.0:             # pure L1: avoids 0/0 hazards inside where
        return abs_diff
    half_over_beta = 0.5 / beta  # python-float constants: no per-element divide
    half_beta = 0.5 * beta
    return jnp.where(abs_diff < beta, half_over_beta * diff * diff,
                     abs_diff - half_beta)


def _reduce_kernel(pred_ref, gt_ref, out_ref, acc_ref, *, beta, rows,
                   block_rows, tiles_per_core, masked):
    i = pl.program_id(1)

    @pl.when(i == 0)
    def _():
        acc_ref[...] = jnp.zeros_like(acc_ref)

    pred = pred_ref[...].astype(jnp.float32)
    gt = gt_ref[...].astype(jnp.float32)
    loss = _smooth_l1_elem(pred, gt, beta)

    if masked:
        # Zero rows past the true extent (partial last tile and/or tiles
        # duplicated by the clamped index_map of the uneven core split).
        c = pl.program_id(0)
        tile = c * tiles_per_core + i
        row_idx = lax.broadcasted_iota(jnp.int32, loss.shape, 0)
        loss = jnp.where(tile * block_rows + row_idx < rows, loss, 0.0)

    # Block-shaped accumulator: pure VPU adds per step; single XLU reduce at end.
    acc_ref[...] += loss

    @pl.when(i == pl.num_programs(1) - 1)
    def _():
        out_ref[...] = jnp.sum(acc_ref[...]).reshape(out_ref.shape)


def _none_kernel(pred_ref, gt_ref, out_ref, *, beta):
    # Compute natively in the input dtype (no f32 round-trip on this mem-bound path).
    out_ref[...] = _smooth_l1_elem(pred_ref[...], gt_ref[...], beta).astype(out_ref.dtype)


def _plan(n_elems, itemsize):
    """Pick (lane_width, padded_n, rows, block_rows, tiles)."""
    w = next((x for x in _LANE_WIDTHS if n_elems % x == 0), 128)
    padded_n = pl.cdiv(n_elems, w) * w
    rows = padded_n // w
    target_rows = max(1, (_TARGET_BLOCK_BYTES // itemsize) // w)
    if rows <= target_rows:
        block_rows = rows                       # single full-extent block
    else:
        block_rows = max(8, (target_rows // 8) * 8)
    tiles = pl.cdiv(rows, block_rows)
    return w, padded_n, rows, block_rows, tiles


def _vmem_limit(footprint_bytes):
    return int(min(max(2 * footprint_bytes, 16 << 20), 48 << 20))


def smooth_l1_loss(prediction, ground_truth, *, beta: float = 1.0,
                   reduction: str = "mean"):
    assert prediction.shape == ground_truth.shape
    if reduction not in ("mean", "sum", "none"):
        raise ValueError(f"unknown reduction: {reduction}")

    orig_shape = prediction.shape
    n_elems = prediction.size

    if n_elems == 0:
        if reduction == "none":
            return jnp.zeros(orig_shape, prediction.dtype)
        val = jnp.nan if reduction == "mean" else 0.0   # matches torch semantics
        return jnp.array(val, dtype=jnp.float32).astype(prediction.dtype)

    itemsize = jnp.dtype(prediction.dtype).itemsize
    w, padded_n, rows, block_rows, tiles = _plan(n_elems, itemsize)

    flat_p = prediction.reshape(-1)
    flat_g = ground_truth.reshape(-1)
    if padded_n != n_elems:
        # Rare fallback (n not a multiple of 128): pad tail with zeros
        # (zero diff -> zero loss). Common case is a free contiguous reshape.
        flat_p = jnp.pad(flat_p, (0, padded_n - n_elems))
        flat_g = jnp.pad(flat_g, (0, padded_n - n_elems))
    pred2d = flat_p.reshape(rows, w)
    gt2d = flat_g.reshape(rows, w)

    in_block_bytes = block_rows * w * itemsize
    beta = float(beta)

    if reduction in ("mean", "sum"):
        nc = _NUM_CORES if tiles >= _NUM_CORES else 1
        tpc = pl.cdiv(tiles, nc)
        masked = (nc * tpc * block_rows) != rows

        def in_map(c, i):
            # Clamp so overshoot tiles (uneven core split) re-read the last
            # valid block; their contribution is masked to zero in-kernel.
            return (jnp.minimum(c * tpc + i, tiles - 1), 0)

        in_spec = pl.BlockSpec((block_rows, w), in_map)
        kernel = functools.partial(
            _reduce_kernel, beta=beta, rows=rows, block_rows=block_rows,
            tiles_per_core=tpc, masked=masked)

        footprint = 2 * 2 * in_block_bytes + block_rows * w * 4  # inputs dbl-buf + acc
        partials = pl.pallas_call(
            kernel,
            out_shape=jax.ShapeDtypeStruct((nc, 1, 1), jnp.float32),
            grid_spec=pltpu.PrefetchScalarGridSpec(
                num_scalar_prefetch=0,
                grid=(nc, tpc),
                in_specs=[in_spec, in_spec],
                out_specs=pl.BlockSpec((1, 1, 1), lambda c, i: (c, 0, 0)),
                scratch_shapes=[pltpu.VMEM((block_rows, w), jnp.float32)],
            ),
            compiler_params=pltpu.CompilerParams(
                dimension_semantics=("parallel", "arbitrary"),
                vmem_limit_bytes=_vmem_limit(footprint)),
        )(pred2d, gt2d)

        total = jnp.sum(partials)
        if reduction == "mean":
            total = total / float(n_elems)
        return total.astype(prediction.dtype)

    # reduction == "none"
    tile_spec = pl.BlockSpec((block_rows, w), lambda i: (i, 0))
    footprint = 2 * 2 * in_block_bytes + 2 * in_block_bytes  # 2 in + 1 out, dbl-buf
    out2d = pl.pallas_call(
        functools.partial(_none_kernel, beta=beta),
        out_shape=jax.ShapeDtypeStruct((rows, w), prediction.dtype),
        grid_spec=pltpu.PrefetchScalarGridSpec(
            num_scalar_prefetch=0,
            grid=(tiles,),
            in_specs=[tile_spec, tile_spec],
            out_specs=tile_spec,
        ),
        compiler_params=pltpu.CompilerParams(
            dimension_semantics=("parallel",),
            vmem_limit_bytes=_vmem_limit(footprint)),
    )(pred2d, gt2d)

    if padded_n != n_elems:
        return out2d.reshape(-1)[:n_elems].reshape(orig_shape)
    return out2d.reshape(orig_shape)


def _reference(prediction, ground_truth, beta=1.0):
    diff = prediction - ground_truth
    abs_diff = jnp.abs(diff)
    if beta == 0.0:
        return abs_diff
    return jnp.where(abs_diff < beta, 0.5 * diff * diff / beta, abs_diff - 0.5 * beta)


if __name__ == "__main__":
    key = jax.random.PRNGKey(0)
    k1, k2, k3, k4 = jax.random.split(key, 4)

    # Main shape consistent with the module's [N, *] contract.
    x_shape = (2, 4, 16, 16)
    prediction = jax.random.normal(k1, x_shape, dtype=jnp.float32)
    ground_truth = jax.random.normal(k2, x_shape, dtype=jnp.float32)

    loss_mean = jax.block_until_ready(
        smooth_l1_loss(prediction, ground_truth, beta=1.0, reduction="mean"))
    loss_sum = jax.block_until_ready(
        smooth_l1_loss(prediction, ground_truth, beta=1.0, reduction="sum"))
    loss_none = jax.block_until_ready(
        smooth_l1_loss(prediction, ground_truth, beta=1.0, reduction="none"))

    ref_elem = _reference(prediction, ground_truth, beta=1.0)
    assert jnp.allclose(loss_mean, ref_elem.mean(), rtol=1e-5, atol=1e-6)
    assert jnp.allclose(loss_sum, ref_elem.sum(), rtol=1e-5, atol=1e-4)
    assert loss_none.shape == x_shape
    assert jnp.allclose(loss_none, ref_elem, rtol=1e-5, atol=1e-6)

    # Odd-sized shape to exercise the tail-padding fallback path.
    y_shape = (3, 5, 7)
    p2 = jax.random.normal(k3, y_shape, dtype=jnp.float32)
    g2 = jax.random.normal(k4, y_shape, dtype=jnp.float32)
    m2 = jax.block_until_ready(smooth_l1_loss(p2, g2, beta=0.5, reduction="mean"))
    n2 = jax.block_until_ready(smooth_l1_loss(p2, g2, beta=0.5, reduction="none"))
    ref2 = _reference(p2, g2, beta=0.5)
    assert jnp.allclose(m2, ref2.mean(), rtol=1e-5, atol=1e-6)
    assert jnp.allclose(n2, ref2, rtol=1e-5, atol=1e-6)

    print("KERNEL_OK")
</pallas_src>

<mosaic_0001>
module attributes {stable_mosaic.version = 11 : i64} {
  func.func @_reduce_kernel(%arg0: i32, %arg1: i32, %arg2: memref<1x2048xf32, #tpu.memory_space<vmem>>, %arg3: memref<1x2048xf32, #tpu.memory_space<vmem>>, %arg4: memref<1x1x1xf32, #tpu.memory_space<vmem>>, %arg5: memref<1x2048xf32, #tpu.memory_space<vmem>>) attributes {dimension_semantics = [#tpu.dimension_semantics<parallel>, #tpu.dimension_semantics<arbitrary>], iteration_bounds = array<i64: 1, 1>, scalar_prefetch = 0 : i64, scratch_operands = 1 : i64, tpu.core_type = #tpu.core_type<tc>, window_params = [{transform_indices = @transform_0, window_bounds = array<i64: 1, 2048>}, {transform_indices = @transform_1, window_bounds = array<i64: 1, 2048>}, {transform_indices = @transform_2, window_bounds = array<i64: 1, 1, 1>}]} {
    %c0_i32 = arith.constant 0 : i32
    %0 = arith.cmpi eq, %arg1, %c0_i32 : i32
    %1 = arith.extui %0 : i1 to i32
    %c0_i32_0 = arith.constant 0 : i32
    %2 = arith.cmpi ne, %1, %c0_i32_0 : i32
    scf.if %2 {
      %cst_12 = arith.constant 0.000000e+00 : f32
      %21 = vector.broadcast %cst_12 : f32 to vector<1x2048xf32>
      %c0_13 = arith.constant 0 : index
      %c0_14 = arith.constant 0 : index
      %22 = vector.load %arg5[%c0_13, %c0_14] : memref<1x2048xf32, #tpu.memory_space<vmem>>, vector<1x2048xf32>
      tpu.vector_store %arg5[%c0_13, %c0_14], %21 {strides = array<i32>} : memref<1x2048xf32, #tpu.memory_space<vmem>>, vector<1x2048xf32>,
    } else {
    }
    %c0 = arith.constant 0 : index
    %c0_1 = arith.constant 0 : index
    %3 = vector.load %arg2[%c0, %c0_1] : memref<1x2048xf32, #tpu.memory_space<vmem>>, vector<1x2048xf32>
    %c0_2 = arith.constant 0 : index
    %c0_3 = arith.constant 0 : index
    %4 = vector.load %arg3[%c0_2, %c0_3] : memref<1x2048xf32, #tpu.memory_space<vmem>>, vector<1x2048xf32>
    %5 = arith.subf %3, %4 : vector<1x2048xf32>
    %6 = math.absf %5 : vector<1x2048xf32>
    %cst = arith.constant 1.000000e+00 : f32
    %7 = vector.broadcast %cst : f32 to vector<1x2048xf32>
    %8 = arith.cmpf olt, %6, %7 : vector<1x2048xf32>
    %cst_4 = arith.constant 5.000000e-01 : f32
    %9 = vector.broadcast %cst_4 : f32 to vector<1x2048xf32>
    %10 = arith.mulf %9, %5 : vector<1x2048xf32>
    %11 = arith.mulf %10, %5 : vector<1x2048xf32>
    %cst_5 = arith.constant 5.000000e-01 : f32
    %12 = vector.broadcast %cst_5 : f32 to vector<1x2048xf32>
    %13 = arith.subf %6, %12 : vector<1x2048xf32>
    %14 = arith.select %8, %11, %13 : vector<1x2048xi1>, vector<1x2048xf32>
    %c0_6 = arith.constant 0 : index
    %c0_7 = arith.constant 0 : index
    %15 = vector.load %arg5[%c0_6, %c0_7] : memref<1x2048xf32, #tpu.memory_space<vmem>>, vector<1x2048xf32>
    %16 = arith.addf %15, %14 : vector<1x2048xf32>
    %c0_8 = arith.constant 0 : index
    %c0_9 = arith.constant 0 : index
    %17 = vector.load %arg5[%c0_8, %c0_9] : memref<1x2048xf32, #tpu.memory_space<vmem>>, vector<1x2048xf32>
    tpu.vector_store %arg5[%c0_8, %c0_9], %16 {strides = array<i32>} : memref<1x2048xf32, #tpu.memory_space<vmem>>, vector<1x2048xf32>,
    %c0_i32_10 = arith.constant 0 : i32
    %18 = arith.cmpi eq, %arg1, %c0_i32_10 : i32
    %19 = arith.extui %18 : i1 to i32
    %c0_i32_11 = arith.constant 0 : i32
    %20 = arith.cmpi ne, %19, %c0_i32_11 : i32
    scf.if %20 {
      %c0_12 = arith.constant 0 : index
      %c0_13 = arith.constant 0 : index
      %21 = vector.load %arg5[%c0_12, %c0_13] : memref<1x2048xf32, #tpu.memory_space<vmem>>, vector<1x2048xf32>
      %22 = vector.shape_cast %21 : vector<1x2048xf32> to vector<1x1x2048xf32>
      %cst_14 = arith.constant dense<0.000000e+00> : vector<1xf32>
      %23 = vector.multi_reduction <add>, %22, %cst_14 [1, 2] : vector<1x1x2048xf32> to vector<1xf32>
      %24 = vector.shape_cast %23 : vector<1xf32> to vector<1x1x1xf32>
      %25 = vector.extract %24[0, 0, 0] : f32 from vector<1x1x1xf32>
      %26 = vector.broadcast %25 : f32 to vector<1x1x1xf32>
      %c0_15 = arith.constant 0 : index
      %c0_16 = arith.constant 0 : index
      %c0_17 = arith.constant 0 : index
      %27 = vector.load %arg4[%c0_15, %c0_16, %c0_17] : memref<1x1x1xf32, #tpu.memory_space<vmem>>, vector<1x1x1xf32>
      tpu.vector_store %arg4[%c0_15, %c0_16, %c0_17], %26 {strides = array<i32>} : memref<1x1x1xf32, #tpu.memory_space<vmem>>, vector<1x1x1xf32>,
    } else {
    }
    return
  }
  func.func @transform_0(%arg0: i32, %arg1: i32) -> (i32, i32) {
    %c1_i32 = arith.constant 1 : i32
    %0 = arith.muli %arg0, %c1_i32 : i32
    %1 = arith.addi %0, %arg1 : i32
    %c0_i32 = arith.constant 0 : i32
    %2 = arith.minsi %1, %c0_i32 : i32
    %c0_i32_0 = arith.constant 0 : i32
    %c0_i32_1 = arith.constant 0 : i32
    return %2, %c0_i32_0 : i32, i32
  }
  func.func @transform_1(%arg0: i32, %arg1: i32) -> (i32, i32) {
    %c1_i32 = arith.constant 1 : i32
    %0 = arith.muli %arg0, %c1_i32 : i32
    %1 = arith.addi %0, %arg1 : i32
    %c0_i32 = arith.constant 0 : i32
    %2 = arith.minsi %1, %c0_i32 : i32
    %c0_i32_0 = arith.constant 0 : i32
    %c0_i32_1 = arith.constant 0 : i32
    return %2, %c0_i32_0 : i32, i32
  }
  func.func @transform_2(%arg0: i32, %arg1: i32) -> (i32, i32, i32) {
    %c0_i32 = arith.constant 0 : i32
    %c0_i32_0 = arith.constant 0 : i32
    %c0_i32_1 = arith.constant 0 : i32
    return %arg0, %c0_i32, %c0_i32_0 : i32, i32, i32
  }
}

</mosaic_0001>

<bundles_post_ra>
// kernel: tpu_custom_call.1
= control target key start
LH: loop header
LB: loop body
LE: loop exit
PB: predicated region body
PF: predicated region fallthrough
CT: control target
= control target key end

     0   :  { %7 = vsyncpa [#allocation4], 0  ;;  %s394_s0 = inlined_call_operand.hbm [shape: f32[1,2048], index: 0, kind: input, shape index: {}]   ;;  %s395_s1 = inlined_call_operand.hbm [shape: f32[1,2048], index: 1, kind: input, shape index: {}]   ;;  %s396_s2 = inlined_call_operand.hbm [shape: f32[1,1,1], index: 2, kind: output, shape index: {}]  }
   0x1   :  { %8 = vsyncpa [#allocation7], 0 }
   0x2   :  { %9 = vsyncpa [#allocation5], 0  ;;  %s314_s9 = smov [#allocation3]   ;;  %s315_s11 = smov [#allocation6]  }
   0x3   :  { %s22_s10 = sshll.u32 %s314_s9, 4  ;;  %s38_s12 = sshll.u32 %s315_s11, 4  ;;  %s23_s10 = int_to_ptr.vmem [resolvable:$true] %s22_s10  ;;  %s39_s12 = int_to_ptr.vmem [resolvable:$true] %s38_s12 }
   0x4   :  { %s242_s15 = scalar_lea.hbm %s394_s0, 256 }
   0x5   :  { %p243_p0 = scmp.ne.s32.totalorder %s394_s0, %s242_s15  ;;  %p246_p1 = scmp.lt.u32.totalorder %s242_s15, %s394_s0 }
   0x7   :  { %p248_p2 = pnand %p246_p1, %p243_p0 }
   0x9   :  { %251 = shalt.err (!%p248_p2)
}
   0xa   :  { %s252_s20 = scalar_lea.vmem %s23_s10, 256  ;;  %p257_p4 = scmp.lt.s32.totalorder %s23_s10, %s23_s10 }
   0xb   :  { %p253_p3 = scmp.ne.s32.totalorder %s23_s10, %s252_s20  ;;  %p258_p5 = scmp.lt.s32.totalorder %s252_s20, %s252_s20 }
   0xd   :  { %p259_p6 = por %p258_p5, %p257_p4 }
   0xf   :  { %p260_p7 = pnand %p259_p6, %p253_p3 }
  0x11   :  { %263 = shalt.err (!%p260_p7)
}
  0x12   :  { %25 = dma.hbm_to_vmem [thread:$0]  %s394_s0, 256, %s23_s10, [#allocation4]  }
  0x13   :  { %s264_s25 = scalar_lea.hbm %s395_s1, 256 }
  0x14   :  { %p265_p8 = scmp.ne.s32.totalorder %s395_s1, %s264_s25  ;;  %p268_p9 = scmp.lt.u32.totalorder %s264_s25, %s395_s1 }
  0x16   :  { %p270_p10 = pnand %p268_p9, %p265_p8 }
  0x18   :  { %273 = shalt.err (!%p270_p10)
}
  0x19   :  { %s274_s30 = scalar_lea.vmem %s39_s12, 256  ;;  %p279_p12 = scmp.lt.s32.totalorder %s39_s12, %s39_s12 }
  0x1a   :  { %p275_p11 = scmp.ne.s32.totalorder %s39_s12, %s274_s30  ;;  %p280_p13 = scmp.lt.s32.totalorder %s274_s30, %s274_s30 }
  0x1c   :  { %p281_p0 = por %p280_p13, %p279_p12 }
  0x1e   :  { %p282_p1 = pnand %p281_p0, %p275_p11 }
  0x20   :  { %285 = shalt.err (!%p282_p1)
}
  0x21   :  { %41 = dma.hbm_to_vmem [thread:$0]  %s395_s1, 256, %s39_s12, [#allocation7]  }
  0x22   :  { %308 = dma.done.wait [#allocation4], 256  }
  0x23   :  { %309 = vsyncadd [#allocation4], 4294967040 }
  0x24   :  { %310 = dma.done.wait [#allocation7], 256  }
  0x25   :  { %311 = vsyncadd [#allocation7], 4294967040  ;;  %v91_v0 = vlaneseq  ;;  %v60_v1 = vld [vmem:[#allocation3] sm:$0xff]  ;;  %v62_v2 = vld [vmem:[#allocation6] sm:$0xff]  ;;  %vm171_vm1 = vcmask 1040384   ;;  %s316_s1 = smov [#allocation8]  }
  0x26   :  { %v64_v4 = vsub.f32 %v60_v1, %v62_v2  ;;  %v61_v5 = vld [vmem:[#allocation3 + $0x8] sm:$0xff]  ;;  %v63_v6 = vld [vmem:[#allocation6 + $0x8] sm:$0xff]  ;;  %s221_s4 = sshll.u32 %s316_s1, 4  ;;  %vm213_vm3 = vcmask 0   ;;  %s222_s4 = int_to_ptr.vmem [resolvable:$true] %s221_s4 }
  0x27   :  { %v356_v3 = vshrl.u32 %v91_v0, 7  ;;  %v65_v12 = vsub.f32 %v61_v5, %v63_v6  ;;  %s286_s6 = scalar_lea.vmem %s222_s4, 16  ;;  %s290_s7 = scalar_lea.vmem %s222_s4, 32 }
  0x28   :  { %v66_v7 = vand.u32 2147483647, %v64_v4  ;;  %v70_v8 = vmul.f32 0.5, %v64_v4  ;;  %p287_p2 = scmp.ne.s32.totalorder %s222_s4, %s286_s6  ;;  %p291_p3 = scmp.lt.s32.totalorder %s222_s4, %s222_s4 }
  0x29   :  { %v93_v9 = vsub.s32 0, %v356_v3  ;;  %v97_v10 = vsub.s32 1, %v356_v3  ;;  %v101_v11 = vsub.s32 2, %v356_v3  ;;  %v105_v15 = vsub.s32 3, %v356_v3  ;;  %p292_p4 = scmp.lt.s32.totalorder %s290_s7, %s286_s6 }
  0x2a   :  { %vm68_vm0 = vcmp.lt.f32.partialorder %v66_v7, 1.0  ;;  %v72_v13 = vmul.f32 %v70_v8, %v64_v4  ;;  %v235_v14 = vadd.f32 -0.5, %v66_v7  ;;  %v109_v20 = vsub.s32 4, %v356_v3 }
  0x2b   :  { %v67_v21 = vand.u32 2147483647, %v65_v12  ;;  %v71_v22 = vmul.f32 0.5, %v65_v12  ;;  %v113_v24 = vsub.s32 5, %v356_v3  ;;  %v117_v25 = vsub.s32 6, %v356_v3  ;;  %p293_p5 = por %p292_p4, %p291_p3 }
  0x2c   :  { %v76_v16 = vsel %vm68_vm0, %v72_v13, %v235_v14  ;;  %v121_v34 = vsub.s32 7, %v356_v3 }
  0x2d   :  { %v94_v17 = vrot.slane %v76_v16, %v93_v9  ;;  %v98_v18 = vrot.slane %v76_v16, %v97_v10  ;;  %v102_v19 = vrot.slane %v76_v16, %v101_v11  ;;  %v106_v23 = vrot.slane %v76_v16, %v105_v15  ;;  %p294_p6 = pnand %p293_p5, %p287_p2 }
  0x2e   :  { %v110_v26 = vrot.slane %v76_v16, %v109_v20  ;;  %v73_v30 = vmul.f32 %v71_v22, %v65_v12  ;;  %v236_v31 = vadd.f32 -0.5, %v67_v21  ;;  %vm69_vm2 = vcmp.lt.f32.partialorder %v67_v21, 1.0 }
  0x2f   :  { %v172_v27 = vsel %vm171_vm1, %v94_v17, 0.0  ;;  %v173_v28 = vsel %vm171_vm1, %v98_v18, 0.0  ;;  %v175_v29 = vsel %vm171_vm1, %v102_v19, 0.0  ;;  %v114_v33 = vrot.slane %v76_v16, %v113_v24 }
  0x30   :  { %v174_v32 = vadd.f32 %v173_v28, %v172_v27  ;;  %v177_v35 = vsel %vm171_vm1, %v106_v23, 0.0  ;;  %v118_v37 = vrot.slane %v76_v16, %v117_v25  ;;  %v179_v38 = vsel %vm171_vm1, %v110_v26, 0.0 }
  0x31   :  { %v77_v39 = vsel %vm69_vm2, %v73_v30, %v236_v31  ;;  %v122_v41 = vrot.slane %v76_v16, %v121_v34  ;;  %v181_v42 = vsel %vm171_vm1, %v114_v33, 0.0 }
  0x32   :  { %v176_v36 = vadd.f32 %v175_v29, %v174_v32  ;;  %v126_v44 = vrot.slane %v77_v39, %v93_v9  ;;  %v183_v45 = vsel %vm171_vm1, %v118_v37, 0.0  ;;  %v130_v47 = vrot.slane %v77_v39, %v97_v10 }
  0x33   :  { %v185_v48 = vsel %vm171_vm1, %v122_v41, 0.0  ;;  %v134_v50 = vrot.slane %v77_v39, %v101_v11  ;;  %v138_v53 = vrot.slane %v77_v39, %v105_v15  ;;  %v142_v56 = vrot.slane %v77_v39, %v109_v20 }
  0x34   :  { %v178_v40 = vadd.f32 %v177_v35, %v176_v36  ;;  %v187_v51 = vsel %vm171_vm1, %v126_v44, 0.0  ;;  %v189_v54 = vsel %vm171_vm1, %v130_v47, 0.0  ;;  %v146_v59 = vrot.slane %v77_v39, %v113_v24 }
  0x35   :  { %v191_v57 = vsel %vm171_vm1, %v134_v50, 0.0  ;;  %v193_v60 = vsel %vm171_vm1, %v138_v53, 0.0  ;;  %v150_v62 = vrot.slane %v77_v39, %v117_v25  ;;  %v195_v63 = vsel %vm171_vm1, %v142_v56, 0.0 }
  0x36   :  { %v180_v43 = vadd.f32 %v179_v38, %v178_v40  ;;  %v154_v1 = vrot.slane %v77_v39, %v121_v34  ;;  %v197_v2 = vsel %vm171_vm1, %v146_v59, 0.0 }
  0x37   :  { %v199_v4 = vsel %vm171_vm1, %v150_v62, 0.0 }
  0x38   :  { %v182_v46 = vadd.f32 %v181_v42, %v180_v43  ;;  %v201_v6 = vsel %vm171_vm1, %v154_v1, 0.0 }
  0x3a   :  { %v184_v49 = vadd.f32 %v183_v45, %v182_v46 }
  0x3c   :  { %v186_v52 = vadd.f32 %v185_v48, %v184_v49 }
  0x3e   :  { %v188_v55 = vadd.f32 %v187_v51, %v186_v52 }
  0x40   :  { %v190_v58 = vadd.f32 %v189_v54, %v188_v55 }
  0x42   :  { %v192_v61 = vadd.f32 %v191_v57, %v190_v58 }
  0x44   :  { %v194_v0 = vadd.f32 %v193_v60, %v192_v61 }
  0x46   :  { %v196_v3 = vadd.f32 %v195_v63, %v194_v0 }
  0x48   :  { %v198_v5 = vadd.f32 %v197_v2, %v196_v3 }
  0x4a   :  { %v200_v7 = vadd.f32 %v199_v4, %v198_v5 }
  0x4c   :  { %v202_v8 = vadd.f32 %v201_v6, %v200_v7 }
  0x4e   :  { %203 = vadd.xlane.f32.xlu0 %v202_v8 }
  0xdb   :  { %v204_v9 = vpop.xlane.xlu0 %203 }
  0xdc   :  { %v205_v10 = vrot.slane %v204_v9, 4 }
  0xde   :  { %v206_v11 = vadd.f32 %v205_v10, %v204_v9 }
  0xe0   :  { %v207_v12 = vrot.slane %v206_v11, 2 }
  0xe2   :  { %v208_v13 = vadd.f32 %v207_v12, %v206_v11 }
  0xe4   :  { %v209_v14 = vrot.slane %v208_v13, 1 }
  0xe6   :  { %v210_v15 = vadd.f32 %v209_v14, %v208_v13 }
  0xe8   :  { %237 = vpush %v210_v15 }
 0x119   :  { %s238_s5 = spop %237 }
 0x11a   :  { %v212_v16 = vstv %s238_s5 }
 0x11b   :  { %214 = vst.msk [vmem:[#allocation8] sm:$0x1] %vm213_vm3, %v212_v16 }
 0x11c   :  { %297 = shalt.err (!%p294_p6)
}
 0x11d   :  { %s298_s10 = scalar_lea.hbm %s396_s2, 16 }
 0x11e   :  { %p299_p7 = scmp.ne.s32.totalorder %s396_s2, %s298_s10  ;;  %p302_p8 = scmp.lt.u32.totalorder %s298_s10, %s396_s2 }
 0x120   :  { %p304_p9 = pnand %p302_p8, %p299_p7 }
 0x122   :  { %307 = shalt.err (!%p304_p9)
}
 0x123   :  { %224 = dma.vmem_to_hbm [thread:$0]  %s222_s4, 16, %s396_s2, [#allocation5]  }
 0x124   :  { %312 = dma.done.wait [#allocation5], 16  }
 0x125   :  { %313 = vsyncadd [#allocation5], 4294967280 }
 0x126   :  { %228 = vsyncpa [#allocation4], 1 }
 0x127   :  { %229 = vsyncpa [#allocation7], 1 }
 0x128   :  { %230 = vsyncpa [#allocation5], 1 }

</bundles_post_ra>
